<compile_context>
chip_gen: v7x
topology: tpu7x:2x2x1
jax: 0.10.0
libtpu: 0.0.40
codegen_flags: <defaults>
</compile_context>

<pallas_src>
import jax
import jax.numpy as jnp
import numpy as np
from jax.experimental import pallas as pl
from jax.experimental.pallas import tpu as pltpu

LANE = 128   # TPU lane width; all feature dims padded to this in the wrapper.


# ----------------------------- Pallas kernel --------------------------------
def subgcn_kernel(adj_ref, dinv_ref, x_ref, pool_ref, w_ref, b_ref, out_ref,
                  adj_scr, hs_scr, h_scr):
    # adj_ref : (TN, N_pad) bf16   streamed row-tile of (A + I), row = dst, col = src
    # dinv_ref: (N_pad, 1)  f32    (deg(A+I))^-1/2, 0 on padded rows
    # x_ref   : (N_pad, 128) f32   node features (real data in first c_in lanes)
    # pool_ref: (G_pad, N_pad) f32 mean-pooling matrix
    # w_ref   : (3, 128, 128) f32  packed weights, b_ref: (3, 128) f32 packed biases
    # adj_scr : (N_pad, N_pad) bf16 persistent resident adjacency
    # hs_scr  : (N_pad, 128) bf16   dinv * x (bf16 MXU operand for k=0)
    # h_scr   : (N_pad, 128) f32    propagated features h1
    i = pl.program_id(0)
    tn = adj_ref.shape[0]
    row0 = pl.multiple_of(i * tn, tn)

    @pl.when(i == 0)
    def _init():
        hs_scr[...] = (dinv_ref[...] * x_ref[...]).astype(jnp.bfloat16)

    # k = 0 propagation for this row-tile, overlapped with the DMA of the next tile.
    # Ahat @ h == dinv * ((A + I) @ (dinv * h))   (self-loop already baked into adj)
    tile = adj_ref[...]                                  # (TN, N_pad) bf16
    adj_scr[pl.ds(row0, tn), :] = tile                   # keep adjacency resident
    dloc = dinv_ref[pl.ds(row0, tn), :]                  # (TN, 1) f32
    h_scr[pl.ds(row0, tn), :] = dloc * jnp.dot(
        tile, hs_scr[...], preferred_element_type=jnp.float32)

    @pl.when(i == pl.num_programs(0) - 1)
    def _finalize():
        dinv = dinv_ref[...]                             # (N_pad, 1) f32
        adj = adj_scr[...]                               # (N_pad, N_pad) bf16
        h = h_scr[...]                                   # (N_pad, 128) f32  (= h1)

        # k = 1, 2 against the resident bf16 adjacency (no re-streaming from HBM).
        for _ in range(2):
            hs = (dinv * h).astype(jnp.bfloat16)
            h = dinv * jnp.dot(adj, hs, preferred_element_type=jnp.float32)

        # Packed parameter slabs.
        # TODO(synk): if c_in > 128, apply w0 to x BEFORE the K=3 loop
        # (SGConv is associative: Ahat^3 X W = Ahat^3 (X W)).
        w0 = w_ref[0]            # (128, 128) SGConv linear   (c_in   -> hidden)
        w1 = w_ref[1]            # (128, 128) classifier lin1 (hidden -> hidden//2)
        w2 = w_ref[2]            # (128, 128) classifier lin2 (hidden//2 -> nc)
        b = b_ref[...]           # (3, 128)

        # SGConv linear + ReLU.
        h = jnp.maximum(
            jnp.dot(h, w0, preferred_element_type=jnp.float32) + b[0:1, :], 0.0)

        # global_mean_pool as a matmul: (G_pad, N_pad) @ (N_pad, 128).
        g = jnp.dot(pool_ref[...], h, preferred_element_type=jnp.float32)

        # Classifier: Dropout (identity at inference) -> Linear -> ReLU -> Linear.
        g = jnp.maximum(
            jnp.dot(g, w1, preferred_element_type=jnp.float32) + b[1:2, :], 0.0)
        out_ref[...] = jnp.dot(g, w2, preferred_element_type=jnp.float32) + b[2:3, :]


# ------------------------------ JAX glue -------------------------------------
def _round_up(a, m):
    return ((a + m - 1) // m) * m


def _pad2(a, rows, cols):
    r, c = a.shape
    return jnp.zeros((rows, cols), a.dtype).at[:r, :c].set(a)


def _pad1(a, cols):
    return jnp.zeros((cols,), a.dtype).at[: a.shape[0]].set(a)


def _vmem_limit_bytes():
    """~85% of physical VMEM: ~108 MiB on v5e/v6e, ~54 MiB on v7x."""
    try:
        cap = int(pltpu.get_tpu_info().vmem_capacity_bytes)
    except Exception:
        cap = 64 * 1024 * 1024          # conservative fallback (v7x-sized)
    return int(cap * 0.85)


def build_graph_tensors(edge_index, batch, n_nodes, n_graphs):
    """Dense (A + I) (row=dst, col=src), dinv = (deg(A+I))^-1/2, pooling matrix."""
    src, dst = edge_index[0], edge_index[1]
    adj = jnp.zeros((n_nodes, n_nodes), jnp.float32).at[dst, src].add(1.0)
    adj_sl = adj + jnp.eye(n_nodes, dtype=jnp.float32)        # self-loop baked in
    deg = jnp.sum(adj_sl, axis=1)
    dinv = jnp.where(deg > 0, jax.lax.rsqrt(deg), 0.0)[:, None]      # (N, 1)

    counts = jnp.zeros((n_graphs,), jnp.float32).at[batch].add(1.0)
    onehot = (batch[None, :] == jnp.arange(n_graphs)[:, None]).astype(jnp.float32)
    pool = onehot / jnp.maximum(counts, 1.0)[:, None]                # (G, N)
    return adj_sl, dinv, pool


def init_params(key, c_in, hidden, nc):
    """Torch-Linear-style init; weights stored as (fan_in, fan_out)."""
    ks = jax.random.split(key, 6)

    def lin(kw, kb, fan_in, fan_out):
        bound = 1.0 / float(np.sqrt(fan_in))
        w = jax.random.uniform(kw, (fan_in, fan_out), jnp.float32, -bound, bound)
        b = jax.random.uniform(kb, (fan_out,), jnp.float32, -bound, bound)
        return w, b

    w_gcn, b_gcn = lin(ks[0], ks[1], c_in, hidden)          # SGConv.lin
    w_c1, b_c1 = lin(ks[2], ks[3], hidden, hidden // 2)     # classifier Linear 1
    w_c2, b_c2 = lin(ks[4], ks[5], hidden // 2, nc)         # classifier Linear 2
    return {"w_gcn": w_gcn, "b_gcn": b_gcn,
            "w_c1": w_c1, "b_c1": b_c1,
            "w_c2": w_c2, "b_c2": b_c2}


def subgcn_forward(x, edge_index, batch, params, n_graphs, nc, *, row_tile=128):
    n = x.shape[0]
    adj_sl, dinv, pool = build_graph_tensors(edge_index, batch, n, n_graphs)

    n_pad = _round_up(n, row_tile)                 # rows/cols padded to the tile size
    g_pad = max(8, _round_up(n_graphs, 8))         # sublane-aligned pooled batch
    num_tiles = n_pad // row_tile

    # bf16 adjacency: entries are small integers (0/1/2/...), exact in bf16.
    adj_p = _pad2(adj_sl, n_pad, n_pad).astype(jnp.bfloat16)
    dinv_p = _pad2(dinv, n_pad, 1)
    x_p = _pad2(x.astype(jnp.float32), n_pad, LANE)
    pool_p = _pad2(pool, g_pad, n_pad)

    # Pack the 6 parameter tensors into two lane-dense slabs.
    w_slab = jnp.stack([_pad2(params["w_gcn"], LANE, LANE),
                        _pad2(params["w_c1"], LANE, LANE),
                        _pad2(params["w_c2"], LANE, LANE)])           # (3, 128, 128)
    b_slab = jnp.stack([_pad1(params["b_gcn"], LANE),
                        _pad1(params["b_c1"], LANE),
                        _pad1(params["b_c2"], LANE)])                 # (3, 128)

    vmem_whole = pl.BlockSpec(memory_space=pltpu.MemorySpace.VMEM)
    out = pl.pallas_call(
        subgcn_kernel,
        out_shape=jax.ShapeDtypeStruct((g_pad, LANE), jnp.float32),
        grid=(num_tiles,),
        in_specs=[
            pl.BlockSpec((row_tile, n_pad), lambda i: (i, 0)),  # streamed adj row-tiles
            vmem_whole,   # dinv
            vmem_whole,   # x
            vmem_whole,   # pool
            vmem_whole,   # weight slab
            vmem_whole,   # bias slab
        ],
        out_specs=pl.BlockSpec((g_pad, LANE), lambda i: (0, 0)),
        scratch_shapes=[
            pltpu.VMEM((n_pad, n_pad), jnp.bfloat16),   # resident adjacency
            pltpu.VMEM((n_pad, LANE), jnp.bfloat16),    # dinv * x (k=0 MXU operand)
            pltpu.VMEM((n_pad, LANE), jnp.float32),     # h1 rows
        ],
        compiler_params=pltpu.CompilerParams(
            dimension_semantics=("arbitrary",),
            vmem_limit_bytes=_vmem_limit_bytes()),
    )(adj_p, dinv_p, x_p, pool_p, w_slab, b_slab)
    return out[:n_graphs, :nc]


def subgcn_reference(x, edge_index, batch, params, n_graphs):
    """Plain-JAX f32 reference mirroring the PyTorch/PyG inference forward."""
    n = x.shape[0]
    adj_sl, dinv, pool = build_graph_tensors(edge_index, batch, n, n_graphs)
    ahat = dinv * adj_sl * dinv.T
    h = x.astype(jnp.float32)
    for _ in range(3):
        h = ahat @ h
    h = jnp.maximum(h @ params["w_gcn"] + params["b_gcn"], 0.0)
    h_avg = pool @ h                                   # global_mean_pool
    z = jnp.maximum(h_avg @ params["w_c1"] + params["b_c1"], 0.0)   # Dropout = identity
    return z @ params["w_c2"] + params["b_c2"]


# --------------------------------- demo ---------------------------------------
if __name__ == "__main__":
    C_IN, HIDDEN, NC = 4, 32, 7
    N_PER_GRAPH, N_GRAPHS = 8, 2
    N = N_PER_GRAPH * N_GRAPHS

    key = jax.random.PRNGKey(0)
    kx, kp = jax.random.split(key)

    # Node features.
    x = jax.random.normal(kx, (N, C_IN), jnp.float32)

    # Two disjoint undirected ring graphs of 8 nodes each -> edge_index (2, 32).
    src_list, dst_list = [], []
    for g in range(N_GRAPHS):
        base = g * N_PER_GRAPH
        for i in range(N_PER_GRAPH):
            a = base + i
            b = base + (i + 1) % N_PER_GRAPH
            src_list += [a, b]
            dst_list += [b, a]
    edge_index = jnp.array([src_list, dst_list], dtype=jnp.int32)
    batch = jnp.repeat(jnp.arange(N_GRAPHS, dtype=jnp.int32), N_PER_GRAPH)

    params = init_params(kp, C_IN, HIDDEN, NC)

    fwd = jax.jit(lambda xx, ei, bb: subgcn_forward(xx, ei, bb, params, N_GRAPHS, NC))
    out = jax.block_until_ready(fwd(x, edge_index, batch))

    ref = subgcn_reference(x, edge_index, batch, params, N_GRAPHS)
    # bf16 MXU operands over 3 propagation hops -> loosened tolerance vs f32 reference.
    np.testing.assert_allclose(np.asarray(out), np.asarray(ref), rtol=2e-2, atol=2e-2)

    print("KERNEL_OK")
</pallas_src>

<mosaic_0001>
module attributes {stable_mosaic.version = 11 : i64} {
  func.func private @main(%arg0: i32) attributes {dimension_semantics = [#tpu.dimension_semantics<core_parallel>], iteration_bounds = array<i64: 2>, tpu.core_type = #tpu.core_type<sc_scalar_subcore>, window_params = []} {
    return
  }
}

module attributes {stable_mosaic.version = 11 : i64} {
  func.func private @main(%arg0: i32) attributes {dimension_semantics = [#tpu.dimension_semantics<core_parallel>], iteration_bounds = array<i64: 2>, tpu.core_type = #tpu.core_type<sc_scalar_subcore>, window_params = []} {
    return
  }
}

module attributes {stable_mosaic.version = 11 : i64} {
  func.func @subgcn_kernel(%arg0: i32, %arg1: memref<128x128xbf16, #tpu.memory_space<vmem>>, %arg2: memref<128x1xf32, #tpu.memory_space<vmem>>, %arg3: memref<128x128xf32, #tpu.memory_space<vmem>>, %arg4: memref<8x128xf32, #tpu.memory_space<vmem>>, %arg5: memref<3x128x128xf32, #tpu.memory_space<vmem>>, %arg6: memref<3x128xf32, #tpu.memory_space<vmem>>, %arg7: memref<8x128xf32, #tpu.memory_space<vmem>>, %arg8: memref<128x128xbf16, #tpu.memory_space<vmem>>, %arg9: memref<128x128xbf16, #tpu.memory_space<vmem>>, %arg10: memref<128x128xf32, #tpu.memory_space<vmem>>) attributes {dimension_semantics = [#tpu.dimension_semantics<arbitrary>], iteration_bounds = array<i64: 1>, scalar_prefetch = 0 : i64, scratch_operands = 3 : i64, tpu.core_type = #tpu.core_type<tc>, window_params = [{transform_indices = @transform_0, window_bounds = array<i64: 128, 128>}, {pipeline_mode = #tpu.pipeline_mode<synchronous>, transform_indices = @transform_1, window_bounds = array<i64: 128, 1>}, {pipeline_mode = #tpu.pipeline_mode<synchronous>, transform_indices = @transform_2, window_bounds = array<i64: 128, 128>}, {pipeline_mode = #tpu.pipeline_mode<synchronous>, transform_indices = @transform_3, window_bounds = array<i64: 8, 128>}, {pipeline_mode = #tpu.pipeline_mode<synchronous>, transform_indices = @transform_4, window_bounds = array<i64: 3, 128, 128>}, {pipeline_mode = #tpu.pipeline_mode<synchronous>, transform_indices = @transform_5, window_bounds = array<i64: 3, 128>}, {pipeline_mode = #tpu.pipeline_mode<synchronous>, transform_indices = @transform_6, window_bounds = array<i64: 8, 128>}]} {
    %c128_i32 = arith.constant 128 : i32
    %0 = arith.muli %arg0, %c128_i32 : i32
    %1 = tpu.assume_multiple %0, 128 : i32
    %c0_i32 = arith.constant 0 : i32
    %2 = arith.cmpi eq, %arg0, %c0_i32 : i32
    %3 = arith.extui %2 : i1 to i32
    %c0_i32_0 = arith.constant 0 : i32
    %4 = arith.cmpi ne, %3, %c0_i32_0 : i32
    scf.if %4 {
      %c0_9 = arith.constant 0 : index
      %c0_10 = arith.constant 0 : index
      %19 = vector.load %arg2[%c0_9, %c0_10] : memref<128x1xf32, #tpu.memory_space<vmem>>, vector<128x1xf32>
      %c0_11 = arith.constant 0 : index
      %c0_12 = arith.constant 0 : index
      %20 = vector.load %arg3[%c0_11, %c0_12] : memref<128x128xf32, #tpu.memory_space<vmem>>, vector<128x128xf32>
      %21 = vector.broadcast %19 : vector<128x1xf32> to vector<128x128xf32>
      %22 = arith.mulf %21, %20 : vector<128x128xf32>
      %23 = arith.truncf %22 : vector<128x128xf32> to vector<128x128xbf16>
      %c0_13 = arith.constant 0 : index
      %c0_14 = arith.constant 0 : index
      %24 = vector.load %arg9[%c0_13, %c0_14] : memref<128x128xbf16, #tpu.memory_space<vmem>>, vector<128x128xbf16>
      tpu.vector_store %arg9[%c0_13, %c0_14], %23 {strides = array<i32>} : memref<128x128xbf16, #tpu.memory_space<vmem>>, vector<128x128xbf16>,
    } else {
    }
    %c0 = arith.constant 0 : index
    %c0_1 = arith.constant 0 : index
    %5 = vector.load %arg1[%c0, %c0_1] : memref<128x128xbf16, #tpu.memory_space<vmem>>, vector<128x128xbf16>
    %6 = arith.index_cast %1 : i32 to index
    %c0_2 = arith.constant 0 : index
    %7 = vector.load %arg8[%6, %c0_2] : memref<128x128xbf16, #tpu.memory_space<vmem>>, vector<128x128xbf16>
    tpu.vector_store %arg8[%6, %c0_2], %5 {strides = array<i32>} : memref<128x128xbf16, #tpu.memory_space<vmem>>, vector<128x128xbf16>,
    %8 = arith.index_cast %1 : i32 to index
    %c0_3 = arith.constant 0 : index
    %9 = vector.load %arg2[%8, %c0_3] : memref<128x1xf32, #tpu.memory_space<vmem>>, vector<128x1xf32>
    %c0_4 = arith.constant 0 : index
    %c0_5 = arith.constant 0 : index
    %10 = vector.load %arg9[%c0_4, %c0_5] : memref<128x128xbf16, #tpu.memory_space<vmem>>, vector<128x128xbf16>
    %cst = arith.constant dense<0.000000e+00> : vector<128x128xf32>
    %11 = tpu.matmul %5, %10, %cst {dimension_numbers = #tpu.dot_dimension_numbers<[1], [0], [0], [1], [0, 0, 1, 1], [], []>} : vector<128x128xbf16>, vector<128x128xbf16>, vector<128x128xf32> -> vector<128x128xf32>
    %12 = vector.broadcast %9 : vector<128x1xf32> to vector<128x128xf32>
    %13 = arith.mulf %12, %11 : vector<128x128xf32>
    %14 = arith.index_cast %1 : i32 to index
    %c0_6 = arith.constant 0 : index
    %15 = vector.load %arg10[%14, %c0_6] : memref<128x128xf32, #tpu.memory_space<vmem>>, vector<128x128xf32>
    tpu.vector_store %arg10[%14, %c0_6], %13 {strides = array<i32>} : memref<128x128xf32, #tpu.memory_space<vmem>>, vector<128x128xf32>,
    %c0_i32_7 = arith.constant 0 : i32
    %16 = arith.cmpi eq, %arg0, %c0_i32_7 : i32
    %17 = arith.extui %16 : i1 to i32
    %c0_i32_8 = arith.constant 0 : i32
    %18 = arith.cmpi ne, %17, %c0_i32_8 : i32
    scf.if %18 {
      %c0_9 = arith.constant 0 : index
      %c0_10 = arith.constant 0 : index
      %19 = vector.load %arg2[%c0_9, %c0_10] : memref<128x1xf32, #tpu.memory_space<vmem>>, vector<128x1xf32>
      %c0_11 = arith.constant 0 : index
      %c0_12 = arith.constant 0 : index
      %20 = vector.load %arg8[%c0_11, %c0_12] : memref<128x128xbf16, #tpu.memory_space<vmem>>, vector<128x128xbf16>
      %c0_13 = arith.constant 0 : index
      %c0_14 = arith.constant 0 : index
      %21 = vector.load %arg10[%c0_13, %c0_14] : memref<128x128xf32, #tpu.memory_space<vmem>>, vector<128x128xf32>
      %22 = vector.broadcast %19 : vector<128x1xf32> to vector<128x128xf32>
      %23 = arith.mulf %22, %21 : vector<128x128xf32>
      %24 = arith.truncf %23 : vector<128x128xf32> to vector<128x128xbf16>
      %cst_15 = arith.constant dense<0.000000e+00> : vector<128x128xf32>
      %25 = tpu.matmul %20, %24, %cst_15 {dimension_numbers = #tpu.dot_dimension_numbers<[1], [0], [0], [1], [0, 0, 1, 1], [], []>} : vector<128x128xbf16>, vector<128x128xbf16>, vector<128x128xf32> -> vector<128x128xf32>
      %26 = vector.broadcast %19 : vector<128x1xf32> to vector<128x128xf32>
      %27 = arith.mulf %26, %25 : vector<128x128xf32>
      %28 = vector.broadcast %19 : vector<128x1xf32> to vector<128x128xf32>
      %29 = arith.mulf %28, %27 : vector<128x128xf32>
      %30 = arith.truncf %29 : vector<128x128xf32> to vector<128x128xbf16>
      %cst_16 = arith.constant dense<0.000000e+00> : vector<128x128xf32>
      %31 = tpu.matmul %20, %30, %cst_16 {dimension_numbers = #tpu.dot_dimension_numbers<[1], [0], [0], [1], [0, 0, 1, 1], [], []>} : vector<128x128xbf16>, vector<128x128xbf16>, vector<128x128xf32> -> vector<128x128xf32>
      %32 = vector.broadcast %19 : vector<128x1xf32> to vector<128x128xf32>
      %33 = arith.mulf %32, %31 : vector<128x128xf32>
      %c0_17 = arith.constant 0 : index
      %c0_18 = arith.constant 0 : index
      %c0_19 = arith.constant 0 : index
      %34 = vector.load %arg5[%c0_17, %c0_18, %c0_19] : memref<3x128x128xf32, #tpu.memory_space<vmem>>, vector<1x128x128xf32>
      %35 = vector.shape_cast %34 : vector<1x128x128xf32> to vector<128x128xf32>
      %c1 = arith.constant 1 : index
      %c0_20 = arith.constant 0 : index
      %c0_21 = arith.constant 0 : index
      %36 = vector.load %arg5[%c1, %c0_20, %c0_21] : memref<3x128x128xf32, #tpu.memory_space<vmem>>, vector<1x128x128xf32>
      %37 = vector.shape_cast %36 : vector<1x128x128xf32> to vector<128x128xf32>
      %c2 = arith.constant 2 : index
      %c0_22 = arith.constant 0 : index
      %c0_23 = arith.constant 0 : index
      %38 = vector.load %arg5[%c2, %c0_22, %c0_23] : memref<3x128x128xf32, #tpu.memory_space<vmem>>, vector<1x128x128xf32>
      %39 = vector.shape_cast %38 : vector<1x128x128xf32> to vector<128x128xf32>
      %c0_24 = arith.constant 0 : index
      %c0_25 = arith.constant 0 : index
      %40 = vector.load %arg6[%c0_24, %c0_25] : memref<3x128xf32, #tpu.memory_space<vmem>>, vector<3x128xf32>
      %cst_26 = arith.constant dense<0.000000e+00> : vector<128x128xf32>
      %41 = tpu.matmul %33, %35, %cst_26 {dimension_numbers = #tpu.dot_dimension_numbers<[1], [0], [0], [1], [0, 0, 1, 1], [], []>} : vector<128x128xf32>, vector<128x128xf32>, vector<128x128xf32> -> vector<128x128xf32>
      %42 = vector.extract_strided_slice %40 {offsets = [0, 0], sizes = [1, 128], strides = [1, 1]} : vector<3x128xf32> to vector<1x128xf32>
      %43 = vector.broadcast %42 : vector<1x128xf32> to vector<128x128xf32>
      %44 = arith.addf %41, %43 : vector<128x128xf32>
      %cst_27 = arith.constant 0.000000e+00 : f32
      %45 = vector.broadcast %cst_27 : f32 to vector<128x128xf32>
      %46 = arith.maximumf %44, %45 : vector<128x128xf32>
      %c0_28 = arith.constant 0 : index
      %c0_29 = arith.constant 0 : index
      %47 = vector.load %arg4[%c0_28, %c0_29] : memref<8x128xf32, #tpu.memory_space<vmem>>, vector<8x128xf32>
      %cst_30 = arith.constant dense<0.000000e+00> : vector<8x128xf32>
      %48 = tpu.matmul %47, %46, %cst_30 {dimension_numbers = #tpu.dot_dimension_numbers<[1], [0], [0], [1], [0, 0, 1, 1], [], []>} : vector<8x128xf32>, vector<128x128xf32>, vector<8x128xf32> -> vector<8x128xf32>
      %cst_31 = arith.constant dense<0.000000e+00> : vector<8x128xf32>
      %49 = tpu.matmul %48, %37, %cst_31 {dimension_numbers = #tpu.dot_dimension_numbers<[1], [0], [0], [1], [0, 0, 1, 1], [], []>} : vector<8x128xf32>, vector<128x128xf32>, vector<8x128xf32> -> vector<8x128xf32>
      %50 = vector.extract_strided_slice %40 {offsets = [1, 0], sizes = [1, 128], strides = [1, 1]} : vector<3x128xf32> to vector<1x128xf32>
      %51 = vector.broadcast %50 : vector<1x128xf32> to vector<8x128xf32>
      %52 = arith.addf %49, %51 : vector<8x128xf32>
      %cst_32 = arith.constant 0.000000e+00 : f32
      %53 = vector.broadcast %cst_32 : f32 to vector<8x128xf32>
      %54 = arith.maximumf %52, %53 : vector<8x128xf32>
      %cst_33 = arith.constant dense<0.000000e+00> : vector<8x128xf32>
      %55 = tpu.matmul %54, %39, %cst_33 {dimension_numbers = #tpu.dot_dimension_numbers<[1], [0], [0], [1], [0, 0, 1, 1], [], []>} : vector<8x128xf32>, vector<128x128xf32>, vector<8x128xf32> -> vector<8x128xf32>
      %56 = vector.extract_strided_slice %40 {offsets = [2, 0], sizes = [1, 128], strides = [1, 1]} : vector<3x128xf32> to vector<1x128xf32>
      %57 = vector.broadcast %56 : vector<1x128xf32> to vector<8x128xf32>
      %58 = arith.addf %55, %57 : vector<8x128xf32>
      %c0_34 = arith.constant 0 : index
      %c0_35 = arith.constant 0 : index
      %59 = vector.load %arg7[%c0_34, %c0_35] : memref<8x128xf32, #tpu.memory_space<vmem>>, vector<8x128xf32>
      tpu.vector_store %arg7[%c0_34, %c0_35], %58 {strides = array<i32>} : memref<8x128xf32, #tpu.memory_space<vmem>>, vector<8x128xf32>,
    } else {
    }
    return
  }
  func.func @transform_0(%arg0: i32) -> (i32, i32) {
    %c0_i32 = arith.constant 0 : i32
    %c0_i32_0 = arith.constant 0 : i32
    return %arg0, %c0_i32 : i32, i32
  }
  func.func @transform_1(%arg0: i32) -> (i32, i32) {
    %c0_i32 = arith.constant 0 : i32
    %c0_i32_0 = arith.constant 0 : i32
    %c0_i32_1 = arith.constant 0 : i32
    return %c0_i32, %c0_i32_0 : i32, i32
  }
  func.func @transform_2(%arg0: i32) -> (i32, i32) {
    %c0_i32 = arith.constant 0 : i32
    %c0_i32_0 = arith.constant 0 : i32
    %c0_i32_1 = arith.constant 0 : i32
    return %c0_i32, %c0_i32_0 : i32, i32
  }
  func.func @transform_3(%arg0: i32) -> (i32, i32) {
    %c0_i32 = arith.constant 0 : i32
    %c0_i32_0 = arith.constant 0 : i32
    %c0_i32_1 = arith.constant 0 : i32
    return %c0_i32, %c0_i32_0 : i32, i32
  }
  func.func @transform_4(%arg0: i32) -> (i32, i32, i32) {
    %c0_i32 = arith.constant 0 : i32
    %c0_i32_0 = arith.constant 0 : i32
    %c0_i32_1 = arith.constant 0 : i32
    %c0_i32_2 = arith.constant 0 : i32
    return %c0_i32, %c0_i32_0, %c0_i32_1 : i32, i32, i32
  }
  func.func @transform_5(%arg0: i32) -> (i32, i32) {
    %c0_i32 = arith.constant 0 : i32
    %c0_i32_0 = arith.constant 0 : i32
    %c0_i32_1 = arith.constant 0 : i32
    return %c0_i32, %c0_i32_0 : i32, i32
  }
  func.func @transform_6(%arg0: i32) -> (i32, i32) {
    %c0_i32 = arith.constant 0 : i32
    %c0_i32_0 = arith.constant 0 : i32
    %c0_i32_1 = arith.constant 0 : i32
    return %c0_i32, %c0_i32_0 : i32, i32
  }
}

</mosaic_0001>

<bundles_post_ra>
// kernel: _lambda_.1
= control target key start
LH: loop header
LB: loop body
LE: loop exit
PB: predicated region body
PF: predicated region fallthrough
CT: control target
= control target key end

     0   :  { %v1870_v0 = vmov 0   ;;  %vm1872_vm0 = vmmov 0   ;;  %s2376_s1 = inlined_call_operand.vmem [shape: f32[128,1], index: 1, kind: input, shape index: {}]   ;;  %s2377_s0 = inlined_call_operand.vmem [shape: bf16[128,128], index: 0, kind: input, shape index: {}]   ;;  %s2378_s2 = inlined_call_operand.vmem [shape: f32[128,128], index: 2, kind: input, shape index: {}]   ;;  %s2379_s4 = inlined_call_operand.vmem [shape: f32[3,128,128], index: 4, kind: input, shape index: {}]   ;;  %s2380_s5 = inlined_call_operand.vmem [shape: f32[3,128], index: 5, kind: input, shape index: {}]   ;;  %s2381_s3 = inlined_call_operand.vmem [shape: f32[8,128], index: 3, kind: input, shape index: {}]   ;;  %s2382_s6 = inlined_call_operand.vmem [shape: f32[8,128], index: 6, kind: output, shape index: {}]  }
   0x1   :  { %1861 = vset.pattern.permute.xlu1 %v1870_v0  ;;  %1860 = vset.pattern.permute.xlu0 %v1870_v0  ;;  %v31_v1 = vld [vmem:[%s2376_s1 + $0x10] sm:$0xff]  ;;  %v29_v2 = vld [vmem:[%s2376_s1] sm:$0xff]  ;;  %v32_v3 = vld [vmem:[%s2376_s1 + $0x18] sm:$0xff] }
   0x2   :  { %73 = vperm.xlu1 %1861, %v31_v1   ;;  %63 = vperm.xlu0 %1860, %v29_v2   ;;  %v30_v4 = vld [vmem:[%s2376_s1 + $0x8] sm:$0xff]  ;;  %v33_v6 = vld [vmem:[%s2376_s1 + $0x20] sm:$0xff]  ;;  %v36_v7 = vld [vmem:[%s2376_s1 + $0x38] sm:$0xff] }
   0x3   :  { %v34_v5 = vld [vmem:[%s2376_s1 + $0x28] sm:$0xff]  ;;  %v35_v8 = vld [vmem:[%s2376_s1 + $0x30] sm:$0xff]  ;;  %v37_v10 = vld [vmem:[%s2376_s1 + $0x40] sm:$0xff] }
   0x4   :  { %v38_v9 = vld [vmem:[%s2376_s1 + $0x48] sm:$0xff]  ;;  %v40_v11 = vld [vmem:[%s2376_s1 + $0x58] sm:$0xff]  ;;  %v39_v12 = vld [vmem:[%s2376_s1 + $0x50] sm:$0xff] }
   0x5   :  { %v42_v13 = vld [vmem:[%s2376_s1 + $0x68] sm:$0xff]  ;;  %v41_v14 = vld [vmem:[%s2376_s1 + $0x60] sm:$0xff]  ;;  %v44_v15 = vld [vmem:[%s2376_s1 + $0x78] sm:$0xff] }
   0x6   :  { %78 = vperm.xlu1 %1861, %v32_v3   ;;  %68 = vperm.xlu0 %1860, %v30_v4   ;;  %v43_v16 = vld [vmem:[%s2376_s1 + $0x70] sm:$0xff]  ;;  %v1960_v17 = vld [vmem:[%s2377_s0] sm:$0xff]   ;;  %v48_v22 = vld [vmem:[%s2378_s2 + $0x18] sm:$0xff] }
   0x7   :  { %1511 = vmatprep.mubr.bf16.mxu0 %v1960_v17  ;;  %1543 = vmatprep.mubr.bf16.mxu1 %v1960_v17  ;;  %v47_v20 = vld [vmem:[%s2378_s2 + $0x10] sm:$0xff]  ;;  %v45_v21 = vld [vmem:[%s2378_s2] sm:$0xff]  ;;  %v46_v23 = vld [vmem:[%s2378_s2 + $0x8] sm:$0xff] }
   0x8   :  { %v50_v30 = vld [vmem:[%s2378_s2 + $0x28] sm:$0xff]  ;;  %v49_v31 = vld [vmem:[%s2378_s2 + $0x20] sm:$0xff]  ;;  %v52_v38 = vld [vmem:[%s2378_s2 + $0x38] sm:$0xff] }
   0x9   :  { %v51_v39 = vld [vmem:[%s2378_s2 + $0x30] sm:$0xff]  ;;  %v54_v45 = vld [vmem:[%s2378_s2 + $0x48] sm:$0xff]  ;;  %v53_v46 = vld [vmem:[%s2378_s2 + $0x40] sm:$0xff] }
   0xa   :  { %88 = vperm.xlu1 %1861, %v34_v5   ;;  %83 = vperm.xlu0 %1860, %v33_v6   ;;  %v56_v52 = vld [vmem:[%s2378_s2 + $0x58] sm:$0xff]  ;;  %v55_v53 = vld [vmem:[%s2378_s2 + $0x50] sm:$0xff]  ;;  %v58_v59 = vld [vmem:[%s2378_s2 + $0x68] sm:$0xff] }
   0xb   :  { %v57_v60 = vld [vmem:[%s2378_s2 + $0x60] sm:$0xff] }
   0xe   :  { %98 = vperm.xlu1 %1861, %v36_v7   ;;  %93 = vperm.xlu0 %1860, %v35_v8  }
  0x12   :  { %108 = vperm.xlu1 %1861, %v38_v9   ;;  %103 = vperm.xlu0 %1860, %v37_v10  }
  0x16   :  { %118 = vperm.xlu1 %1861, %v40_v11   ;;  %113 = vperm.xlu0 %1860, %v39_v12  }
  0x1a   :  { %128 = vperm.xlu1 %1861, %v42_v13   ;;  %123 = vperm.xlu0 %1860, %v41_v14  }
  0x1e   :  { %138 = vperm.xlu1 %1861, %v44_v15   ;;  %133 = vperm.xlu0 %1860, %v43_v16  }
  0x22   :  { %378 = vperm.xlu1 %1861, %v30_v4   ;;  %373 = vperm.xlu0 %1860, %v29_v2  }
  0x26   :  { %534 = vperm.xlu1 %1861, %v30_v4   ;;  %529 = vperm.xlu0 %1860, %v29_v2   ;;  %v60_v2 = vld [vmem:[%s2378_s2 + $0x78] sm:$0xff] }
  0x2a   :  { %388 = vperm.xlu1 %1861, %v32_v3   ;;  %383 = vperm.xlu0 %1860, %v31_v1  }
  0x2e   :  { %544 = vperm.xlu1 %1861, %v32_v3   ;;  %539 = vperm.xlu0 %1860, %v31_v1   ;;  %v59_v3 = vld [vmem:[%s2378_s2 + $0x70] sm:$0xff] }
  0x32   :  { %398 = vperm.xlu1 %1861, %v34_v5   ;;  %393 = vperm.xlu0 %1860, %v33_v6  }
  0x36   :  { %554 = vperm.xlu1 %1861, %v34_v5   ;;  %549 = vperm.xlu0 %1860, %v33_v6  }
  0x3a   :  { %408 = vperm.xlu1 %1861, %v36_v7   ;;  %403 = vperm.xlu0 %1860, %v35_v8  }
  0x3e   :  { %564 = vperm.xlu1 %1861, %v36_v7   ;;  %559 = vperm.xlu0 %1860, %v35_v8  }
  0x42   :  { %418 = vperm.xlu1 %1861, %v38_v9   ;;  %413 = vperm.xlu0 %1860, %v37_v10  }
  0x46   :  { %574 = vperm.xlu1 %1861, %v38_v9   ;;  %569 = vperm.xlu0 %1860, %v37_v10   ;;  %v2015_v10 = vld [vmem:[%s2377_s0 + $0x8] sm:$0xff]  }
  0x4a   :  { %428 = vperm.xlu1 %1861, %v40_v11   ;;  %423 = vperm.xlu0 %1860, %v39_v12  }
  0x4e   :  { %584 = vperm.xlu1 %1861, %v40_v11   ;;  %579 = vperm.xlu0 %1860, %v39_v12   ;;  %v2020_v11 = vld [vmem:[%s2377_s0 + $0x10] sm:$0xff]   ;;  %v2027_v12 = vld [vmem:[%s2377_s0 + $0x18] sm:$0xff]  }
  0x52   :  { %438 = vperm.xlu1 %1861, %v42_v13   ;;  %433 = vperm.xlu0 %1860, %v41_v14  }
  0x56   :  { %594 = vperm.xlu1 %1861, %v42_v13   ;;  %589 = vperm.xlu0 %1860, %v41_v14   ;;  %v2032_v13 = vld [vmem:[%s2377_s0 + $0x20] sm:$0xff]   ;;  %v2039_v14 = vld [vmem:[%s2377_s0 + $0x28] sm:$0xff]  }
  0x5a   :  { %448 = vperm.xlu1 %1861, %v44_v15   ;;  %443 = vperm.xlu0 %1860, %v43_v16  }
  0x5e   :  { %604 = vperm.xlu1 %1861, %v44_v15   ;;  %599 = vperm.xlu0 %1860, %v43_v16   ;;  %v2044_v15 = vld [vmem:[%s2377_s0 + $0x30] sm:$0xff]   ;;  %v2051_v16 = vld [vmem:[%s2377_s0 + $0x38] sm:$0xff]  }
  0x81   :  { %v74_v18 = vpop.permute.xlu1 %73  ;;  %v64_v19 = vpop.permute.xlu0 %63 }
  0x82   :  { %v143_v26 = vmul.f32 %v74_v18, %v47_v20  ;;  %v141_v27 = vmul.f32 %v64_v19, %v45_v21 }
  0x85   :  { %v79_v24 = vpop.permute.xlu1 %78  ;;  %v69_v25 = vpop.permute.xlu0 %68 }
  0x86   :  { %v144_v28 = vmul.f32 %v79_v24, %v48_v22  ;;  %v142_v29 = vmul.f32 %v69_v25, %v46_v23 }
  0x88   :  { %v157_v32 = vpack.c.bf16 %v142_v29, %v141_v27  ;;  %v158_v35 = vpack.c.bf16 %v144_v28, %v143_v26 }
  0x89   :  { %v89_v33 = vpop.permute.xlu1 %88  ;;  %v84_v34 = vpop.permute.xlu0 %83 }
  0x8a   :  { %v146_v36 = vmul.f32 %v89_v33, %v50_v30  ;;  %v145_v37 = vmul.f32 %v84_v34, %v49_v31  ;;  %1495 = vmatprep.subr.bf16.mxu0 %v157_v32 }
  0x8b   :  { %1496 = vmatpush3.bf16.msra.mxu0 %v157_v32 }
  0x8c   :  { %1497 = vmatprep.subr.bf16.mxu0 %v158_v35  ;;  %v159_v42 = vpack.c.bf16 %v146_v36, %v145_v37 }
  0x8d   :  { %v99_v40 = vpop.permute.xlu1 %98  ;;  %v94_v41 = vpop.permute.xlu0 %93 }
  0x8e   :  { %v148_v43 = vmul.f32 %v99_v40, %v52_v38  ;;  %v147_v44 = vmul.f32 %v94_v41, %v51_v39 }
  0x8f   :  { %1498 = vmatpush3.bf16.msra.mxu0 %v158_v35 }
  0x90   :  { %1499 = vmatprep.subr.bf16.mxu0 %v159_v42  ;;  %v160_v49 = vpack.c.bf16 %v148_v43, %v147_v44 }
  0x91   :  { %v109_v47 = vpop.permute.xlu1 %108  ;;  %v104_v48 = vpop.permute.xlu0 %103 }
  0x92   :  { %v150_v50 = vmul.f32 %v109_v47, %v54_v45  ;;  %v149_v51 = vmul.f32 %v104_v48, %v53_v46 }
  0x93   :  { %1500 = vmatpush3.bf16.msra.mxu0 %v159_v42 }
  0x94   :  { %1501 = vmatprep.subr.bf16.mxu0 %v160_v49  ;;  %v161_v56 = vpack.c.bf16 %v150_v50, %v149_v51 }
  0x95   :  { %v119_v54 = vpop.permute.xlu1 %118  ;;  %v114_v55 = vpop.permute.xlu0 %113 }
  0x96   :  { %v152_v57 = vmul.f32 %v119_v54, %v56_v52  ;;  %v151_v58 = vmul.f32 %v114_v55, %v55_v53 }
  0x97   :  { %1502 = vmatpush3.bf16.msra.mxu0 %v160_v49 }
  0x98   :  { %1503 = vmatprep.subr.bf16.mxu0 %v161_v56  ;;  %v162_v63 = vpack.c.bf16 %v152_v57, %v151_v58 }
  0x99   :  { %v129_v61 = vpop.permute.xlu1 %128  ;;  %v124_v62 = vpop.permute.xlu0 %123 }
  0x9a   :  { %v154_v0 = vmul.f32 %v129_v61, %v58_v59  ;;  %v153_v1 = vmul.f32 %v124_v62, %v57_v60 }
  0x9b   :  { %1504 = vmatpush3.bf16.msra.mxu0 %v161_v56 }
  0x9c   :  { %1505 = vmatprep.subr.bf16.mxu0 %v162_v63  ;;  %v163_v6 = vpack.c.bf16 %v154_v0, %v153_v1 }
  0x9d   :  { %v139_v4 = vpop.permute.xlu1 %138  ;;  %v134_v5 = vpop.permute.xlu0 %133 }
  0x9e   :  { %v156_v7 = vmul.f32 %v139_v4, %v60_v2  ;;  %v155_v8 = vmul.f32 %v134_v5, %v59_v3 }
  0x9f   :  { %1506 = vmatpush3.bf16.msra.mxu0 %v162_v63 }
  0xa0   :  { %1507 = vmatprep.subr.bf16.mxu0 %v163_v6  ;;  %v164_v9 = vpack.c.bf16 %v156_v7, %v155_v8 }
  0xa1   :  { %v379_v18 = vpop.permute.xlu1 %378  ;;  %v374_v19 = vpop.permute.xlu0 %373 }
  0xa3   :  { %1508 = vmatpush3.bf16.msra.mxu0 %v163_v6 }
  0xa4   :  { %1509 = vmatprep.subr.bf16.mxu0 %v164_v9 }
  0xa5   :  { %v2055_v20 = vpop.permute.xlu1 %534  ;;  %v2057_v21 = vpop.permute.xlu0 %529 }
  0xa7   :  { %1510 = vmatpush3.bf16.msra.mxu0 %v164_v9 }
  0xa9   :  { %v389_v22 = vpop.permute.xlu1 %388  ;;  %v384_v23 = vpop.permute.xlu0 %383 }
  0xaa   :  { %1512 = vmatmul.mubr.bf16.vlgmr.msra.gmra.mrb[0].mxu0 %v2015_v10 }
  0xab   :  { %1515 = vmatprep.mubr.bf16.mxu0 %v2020_v11 }
  0xad   :  { %v2059_v24 = vpop.permute.xlu1 %544  ;;  %v2061_v25 = vpop.permute.xlu0 %539 }
  0xb1   :  { %v399_v26 = vpop.permute.xlu1 %398  ;;  %v394_v27 = vpop.permute.xlu0 %393 }
  0xb2   :  { %1516 = vmatmul.mubr.bf16.gmra.mrb[4].mxu0 %v2027_v12 }
  0xb3   :  { %1519 = vmatprep.mubr.bf16.mxu0 %v2032_v13 }
  0xb5   :  { %v2063_v28 = vpop.permute.xlu1 %554  ;;  %v2065_v29 = vpop.permute.xlu0 %549 }
  0xb9   :  { %v409_v30 = vpop.permute.xlu1 %408 }
  0xba   :  { %1520 = vmatmul.mubr.bf16.gmra.mrb[8].mxu0 %v2039_v14 }
  0xbb   :  { %1523 = vmatprep.mubr.bf16.mxu0 %v2044_v15 }
  0xbd   :  { %v2067_v31 = vpop.permute.xlu1 %564 }
  0xc1   :  { %v419_v33 = vpop.permute.xlu1 %418 }
  0xc2   :  { %1524 = vmatmul.mubr.bf16.gmra.mrb[12].mxu0 %v2051_v16 }
  0xc3   :  { %1575 = vmatprep.mubr.bf16.mxu0 %v1960_v17  ;;  %v404_v17 = vpop.permute.xlu0 %403 }
  0xc5   :  { %v2071_v35 = vpop.permute.xlu1 %574 }
  0xc7   :  { %v2069_v32 = vpop.permute.xlu0 %559 }
  0xc9   :  { %v429_v37 = vpop.permute.xlu1 %428 }
  0xcb   :  { %v414_v34 = vpop.permute.xlu0 %413 }
  0xcd   :  { %v2075_v44 = vpop.permute.xlu1 %584 }
  0xcf   :  { %v2073_v36 = vpop.permute.xlu0 %569 }
  0xd1   :  { %v439_v56 = vpop.permute.xlu1 %438 }
  0xd3   :  { %v424_v38 = vpop.permute.xlu0 %423 }
  0xd5   :  { %v2087_v5 = vpop.permute.xlu1 %594 }
  0xd7   :  { %v2077_v47 = vpop.permute.xlu0 %579 }
  0xdb   :  { %v434_v59 = vpop.permute.xlu0 %433 }
  0xdf   :  { %v2089_v7 = vpop.permute.xlu0 %589 }
 0x17d   :  { %v1513_v39 = vpop.f32.mrb[0].mxu0 }
 0x17e   :  { %v453_v40 = vmul.f32 %v1513_v39, %v384_v23  ;;  %v308_v41 = vpop.f32.mrb[1].mxu0 }
 0x17f   :  { %v451_v42 = vmul.f32 %v374_v19, %v308_v41  ;;  %v1514_v43 = vpop.f32.mrb[2].mxu0  ;;  %v444_v41 = vpop.permute.xlu0 %443 }
 0x180   :  { %v454_v45 = vmul.f32 %v1514_v43, %v389_v22  ;;  %v311_v46 = vpop.f32.mrb[3].mxu0  ;;  %v609_v49 = vmul.f32 %v2061_v25, %v453_v40  ;;  %v449_v40 = vpop.permute.xlu1 %448 }
 0x181   :  { %v452_v48 = vmul.f32 %v379_v18, %v311_v46  ;;  %v607_v51 = vmul.f32 %v2057_v21, %v451_v42 }
 0x182   :  { %v610_v50 = vmul.f32 %v2059_v24, %v454_v45 }
 0x183   :  { %v608_v52 = vmul.f32 %v2055_v20, %v452_v48 }
 0x184   :  { %v624_v53 = vpack.c.bf16 %v610_v50, %v609_v49 }
 0x185   :  { %v1517_v54 = vpop.f32.mrb[4].mxu0  ;;  %v623_v55 = vpack.c.bf16 %v608_v52, %v607_v51  ;;  %v2095_v51 = vpop.permute.xlu1 %604 }
 0x186   :  { %v457_v57 = vmul.f32 %v1517_v54, %v404_v17  ;;  %v324_v58 = vpop.f32.mrb[5].mxu0  ;;  %v2097_v52 = vpop.permute.xlu0 %599 }
 0x187   :  { %v455_v60 = vmul.f32 %v394_v27, %v324_v58  ;;  %v1518_v61 = vpop.f32.mrb[6].mxu0  ;;  %1527 = vmatprep.subr.bf16.mxu1 %v623_v55 }
 0x188   :  { %v458_v62 = vmul.f32 %v1518_v61, %v409_v30  ;;  %v327_v63 = vpop.f32.mrb[7].mxu0  ;;  %1528 = vmatpush3.bf16.msra.mxu1 %v623_v55  ;;  %v613_v1 = vmul.f32 %v2069_v32, %v457_v57  ;;  %v882_v61 = vld [vmem:[%s2379_s4 + $0x8] sm:$0xff] }
 0x189   :  { %v456_v0 = vmul.f32 %v399_v26, %v327_v63  ;;  %1529 = vmatprep.subr.bf16.mxu1 %v624_v53  ;;  %v611_v3 = vmul.f32 %v2065_v29, %v455_v60 }
 0x18a   :  { %v614_v2 = vmul.f32 %v2067_v31, %v458_v62  ;;  %v883_v62 = vld [vmem:[%s2379_s4 + $0x10] sm:$0xff] }
 0x18b   :  { %v612_v4 = vmul.f32 %v2063_v28, %v456_v0  ;;  %v884_v0 = vld [vmem:[%s2379_s4 + $0x18] sm:$0xff] }
 0x18c   :  { %1530 = vmatpush3.bf16.msra.mxu1 %v624_v53  ;;  %v626_v6 = vpack.c.bf16 %v614_v2, %v613_v1  ;;  %v1756_v1 = vpack.c.bf16 %v884_v0, %v883_v62  ;;  %v885_v2 = vld [vmem:[%s2379_s4 + $0x20] sm:$0xff] }
 0x18d   :  { %v1521_v8 = vpop.f32.mrb[8].mxu0  ;;  %v625_v9 = vpack.c.bf16 %v612_v4, %v611_v3  ;;  %v886_v3 = vld [vmem:[%s2379_s4 + $0x28] sm:$0xff] }
 0x18e   :  { %v461_v18 = vmul.f32 %v1521_v8, %v424_v38  ;;  %v340_v19 = vpop.f32.mrb[9].mxu0  ;;  %v1760_v4 = vpack.c.bf16 %v886_v3, %v885_v2  ;;  %v888_v8 = vld [vmem:[%s2379_s4 + $0x38] sm:$0xff] }
 0x18f   :  { %v459_v22 = vmul.f32 %v414_v34, %v340_v19  ;;  %v1522_v23 = vpop.f32.mrb[10].mxu0  ;;  %1531 = vmatprep.subr.bf16.mxu1 %v625_v9  ;;  %v890_v19 = vld [vmem:[%s2379_s4 + $0x48] sm:$0xff] }
 0x190   :  { %v462_v26 = vmul.f32 %v1522_v23, %v429_v37  ;;  %v343_v27 = vpop.f32.mrb[11].mxu0  ;;  %1532 = vmatpush3.bf16.msra.mxu1 %v625_v9  ;;  %v617_v17 = vmul.f32 %v2077_v47, %v461_v18  ;;  %v889_v18 = vld [vmem:[%s2379_s4 + $0x40] sm:$0xff]  ;;  %v891_v23 = vld [vmem:[%s2379_s4 + $0x50] sm:$0xff] }
 0x191   :  { %v460_v30 = vmul.f32 %v419_v33, %v343_v27  ;;  %1533 = vmatprep.subr.bf16.mxu1 %v626_v6  ;;  %v615_v42 = vmul.f32 %v2073_v36, %v459_v22  ;;  %v1768_v22 = vpack.c.bf16 %v890_v19, %v889_v18 }
 0x192   :  { %v618_v39 = vmul.f32 %v2075_v44, %v462_v26  ;;  %v892_v26 = vld [vmem:[%s2379_s4 + $0x58] sm:$0xff] }
 0x193   :  { %v616_v43 = vmul.f32 %v2071_v35, %v460_v30  ;;  %v1772_v27 = vpack.c.bf16 %v892_v26, %v891_v23  ;;  %v893_v30 = vld [vmem:[%s2379_s4 + $0x60] sm:$0xff] }
 0x194   :  { %1534 = vmatpush3.bf16.msra.mxu1 %v626_v6  ;;  %v628_v38 = vpack.c.bf16 %v618_v39, %v617_v17  ;;  %v887_v6 = vld [vmem:[%s2379_s4 + $0x30] sm:$0xff]  ;;  %v894_v17 = vld [vmem:[%s2379_s4 + $0x68] sm:$0xff] }
 0x195   :  { %v1525_v34 = vpop.f32.mrb[12].mxu0  ;;  %v627_v45 = vpack.c.bf16 %v616_v43, %v615_v42  ;;  %v1764_v9 = vpack.c.bf16 %v888_v8, %v887_v6  ;;  %v1776_v39 = vpack.c.bf16 %v894_v17, %v893_v30 }
 0x196   :  { %v465_v46 = vmul.f32 %v1525_v34, %v444_v41  ;;  %v356_v37 = vpop.f32.mrb[13].mxu0 }
 0x197   :  { %v463_v48 = vmul.f32 %v434_v59, %v356_v37  ;;  %v1526_v49 = vpop.f32.mrb[14].mxu0  ;;  %1535 = vmatprep.subr.bf16.mxu1 %v627_v45 }
 0x198   :  { %v466_v33 = vmul.f32 %v1526_v49, %v449_v40  ;;  %v359_v50 = vpop.f32.mrb[15].mxu0  ;;  %1536 = vmatpush3.bf16.msra.mxu1 %v627_v45  ;;  %v621_v54 = vmul.f32 %v2097_v52, %v465_v46 }
 0x199   :  { %v464_v53 = vmul.f32 %v439_v56, %v359_v50  ;;  %1537 = vmatprep.subr.bf16.mxu1 %v628_v38  ;;  %v619_v57 = vmul.f32 %v2089_v7, %v463_v48  ;;  %v881_v56 = vld [vmem:[%s2379_s4] sm:$0xff] }
 0x19a   :  { %v622_v55 = vmul.f32 %v2095_v51, %v466_v33  ;;  %v1752_v63 = vpack.c.bf16 %v882_v61, %v881_v56 }
 0x19b   :  { %v620_v58 = vmul.f32 %v2087_v5, %v464_v53 }
 0x19c   :  { %1538 = vmatpush3.bf16.msra.mxu1 %v628_v38  ;;  %v630_v59 = vpack.c.bf16 %v622_v55, %v621_v54 }
 0x19d   :  { %v629_v60 = vpack.c.bf16 %v620_v58, %v619_v57 }
 0x19f   :  { %1539 = vmatprep.subr.bf16.mxu1 %v629_v60 }
 0x1a0   :  { %1540 = vmatpush3.bf16.msra.mxu1 %v629_v60 }
 0x1a1   :  { %1541 = vmatprep.subr.bf16.mxu1 %v630_v59 }
 0x1a4   :  { %1542 = vmatpush3.bf16.msra.mxu1 %v630_v59 }
 0x1a5   :  { %1753 = vmatprep.subr.bf16.mxu1 %v1752_v63 }
 0x1a7   :  { %1544 = vmatmul.mubr.bf16.vlgmr.msra.gmra.mrb[0].mxu1 %v2015_v10 }
 0x1a8   :  { %1547 = vmatprep.mubr.bf16.mxu1 %v2020_v11  ;;  %1755 = vmatpush3.bf16.msra.mxu1 %v1752_v63 }
 0x1a9   :  { %1757 = vmatprep.subr.bf16.mxu1 %v1756_v1 }
 0x1ac   :  { %1759 = vmatpush3.bf16.msra.mxu1 %v1756_v1 }
 0x1ad   :  { %1761 = vmatprep.subr.bf16.mxu1 %v1760_v4 }
 0x1af   :  { %1548 = vmatmul.mubr.bf16.gmra.mrb[4].mxu1 %v2027_v12 }
 0x1b0   :  { %1551 = vmatprep.mubr.bf16.mxu1 %v2032_v13  ;;  %1763 = vmatpush3.bf16.msra.mxu1 %v1760_v4 }
 0x1b1   :  { %1765 = vmatprep.subr.bf16.mxu1 %v1764_v9 }
 0x1b4   :  { %1767 = vmatpush3.bf16.msra.mxu1 %v1764_v9 }
 0x1b5   :  { %1769 = vmatprep.subr.bf16.mxu1 %v1768_v22 }
 0x1b7   :  { %1552 = vmatmul.mubr.bf16.gmra.mrb[8].mxu1 %v2039_v14 }
 0x1b8   :  { %1555 = vmatprep.mubr.bf16.mxu1 %v2044_v15  ;;  %1771 = vmatpush3.bf16.msra.mxu1 %v1768_v22 }
 0x1b9   :  { %1773 = vmatprep.subr.bf16.mxu1 %v1772_v27 }
 0x1bc   :  { %1775 = vmatpush3.bf16.msra.mxu1 %v1772_v27 }
 0x1bd   :  { %1777 = vmatprep.subr.bf16.mxu1 %v1776_v39 }
 0x1bf   :  { %1556 = vmatmul.mubr.bf16.gmra.mrb[12].mxu1 %v2051_v16 }
 0x1c0   :  { %1779 = vmatpush3.bf16.msra.mxu1 %v1776_v39 }
 0x27a   :  { %v1545_v40 = vpop.f32.mrb[0].mxu1 }
 0x27b   :  { %v730_v41 = vmul.f32 %v1545_v40, %v2061_v25  ;;  %v665_v42 = vpop.f32.mrb[1].mxu1 }
 0x27c   :  { %v728_v43 = vmul.f32 %v665_v42, %v2057_v21  ;;  %v1546_v38 = vpop.f32.mrb[2].mxu1 }
 0x27d   :  { %v731_v34 = vmul.f32 %v1546_v38, %v2059_v24  ;;  %v668_v45 = vpop.f32.mrb[3].mxu1  ;;  %v746_v37 = vmul.f32 %v730_v41, %v2061_v25 }
 0x27e   :  { %v729_v46 = vmul.f32 %v668_v45, %v2055_v20  ;;  %v744_v49 = vmul.f32 %v728_v43, %v2057_v21 }
 0x27f   :  { %v747_v48 = vmul.f32 %v731_v34, %v2059_v24 }
 0x280   :  { %v745_v33 = vmul.f32 %v729_v46, %v2055_v20 }
 0x281   :  { %v761_v50 = vpack.c.bf16 %v747_v48, %v746_v37 }
 0x282   :  { %v1549_v53 = vpop.f32.mrb[4].mxu1  ;;  %v760_v54 = vpack.c.bf16 %v745_v33, %v744_v49 }
 0x283   :  { %v734_v55 = vmul.f32 %v1549_v53, %v2069_v32  ;;  %v681_v57 = vpop.f32.mrb[5].mxu1 }
 0x284   :  { %v732_v58 = vmul.f32 %v681_v57, %v2065_v29  ;;  %v1550_v59 = vpop.f32.mrb[6].mxu1  ;;  %1559 = vmatprep.subr.bf16.mxu0 %v760_v54 }
 0x285   :  { %v735_v60 = vmul.f32 %v1550_v59, %v2067_v31  ;;  %v684_v56 = vpop.f32.mrb[7].mxu1  ;;  %1560 = vmatpush3.bf16.msra.mxu0 %v760_v54  ;;  %v750_v62 = vmul.f32 %v734_v55, %v2069_v32  ;;  %v895_v55 = vld [vmem:[%s2379_s4 + $0x70] sm:$0xff] }
 0x286   :  { %v733_v61 = vmul.f32 %v684_v56, %v2063_v28  ;;  %1561 = vmatprep.subr.bf16.mxu0 %v761_v50  ;;  %v748_v0 = vmul.f32 %v732_v58, %v2065_v29 }
 0x287   :  { %v751_v63 = vmul.f32 %v735_v60, %v2067_v31 }
 0x288   :  { %v749_v1 = vmul.f32 %v733_v61, %v2063_v28 }
 0x289   :  { %1562 = vmatpush3.bf16.msra.mxu0 %v761_v50  ;;  %v763_v2 = vpack.c.bf16 %v751_v63, %v750_v62 }
 0x28a   :  { %v1553_v3 = vpop.f32.mrb[8].mxu1  ;;  %v762_v4 = vpack.c.bf16 %v749_v1, %v748_v0 }
 0x28b   :  { %v738_v6 = vmul.f32 %v1553_v3, %v2077_v47  ;;  %v697_v8 = vpop.f32.mrb[9].mxu1 }
 0x28c   :  { %v736_v9 = vmul.f32 %v697_v8, %v2073_v36  ;;  %v1554_v18 = vpop.f32.mrb[10].mxu1  ;;  %1563 = vmatprep.subr.bf16.mxu0 %v762_v4 }
 0x28d   :  { %v739_v19 = vmul.f32 %v1554_v18, %v2075_v44  ;;  %v700_v22 = vpop.f32.mrb[11].mxu1  ;;  %1564 = vmatpush3.bf16.msra.mxu0 %v762_v4  ;;  %v754_v26 = vmul.f32 %v738_v6, %v2077_v47 }
 0x28e   :  { %v737_v23 = vmul.f32 %v700_v22, %v2071_v35  ;;  %1565 = vmatprep.subr.bf16.mxu0 %v763_v2  ;;  %v752_v30 = vmul.f32 %v736_v9, %v2073_v36 }
 0x28f   :  { %v755_v27 = vmul.f32 %v739_v19, %v2075_v44  ;;  %v1335_v19 = vld [vmem:[%s2379_s4 + $0x98] sm:$0xff] }
 0x290   :  { %v753_v17 = vmul.f32 %v737_v23, %v2071_v35  ;;  %v1336_v23 = vld [vmem:[%s2379_s4 + $0xa0] sm:$0xff] }
 0x291   :  { %1566 = vmatpush3.bf16.msra.mxu0 %v763_v2  ;;  %v765_v39 = vpack.c.bf16 %v755_v27, %v754_v26  ;;  %v1337_v26 = vld [vmem:[%s2379_s4 + $0xa8] sm:$0xff] }
 0x292   :  { %v1557_v40 = vpop.f32.mrb[12].mxu1  ;;  %v764_v41 = vpack.c.bf16 %v753_v17, %v752_v30  ;;  %v1815_v27 = vpack.c.bf16 %v1337_v26, %v1336_v23  ;;  %v1338_v30 = vld [vmem:[%s2379_s4 + $0xb0] sm:$0xff]  ;;  %v1339_v17 = vld [vmem:[%s2379_s4 + $0xb8] sm:$0xff] }
 0x293   :  { %v742_v42 = vmul.f32 %v1557_v40, %v2097_v52  ;;  %v713_v43 = vpop.f32.mrb[13].mxu1  ;;  %v1340_v40 = vld [vmem:[%s2379_s4 + $0xc0] sm:$0xff] }
 0x294   :  { %v740_v38 = vmul.f32 %v713_v43, %v2089_v7  ;;  %v1558_v34 = vpop.f32.mrb[14].mxu1  ;;  %1567 = vmatprep.subr.bf16.mxu0 %v764_v41  ;;  %v1342_v43 = vld [vmem:[%s2379_s4 + $0xd0] sm:$0xff] }
 0x295   :  { %v743_v45 = vmul.f32 %v1558_v34, %v2095_v51  ;;  %v716_v46 = vpop.f32.mrb[15].mxu1  ;;  %1568 = vmatpush3.bf16.msra.mxu0 %v764_v41  ;;  %v758_v48 = vmul.f32 %v742_v42, %v2097_v52  ;;  %v1341_v41 = vld [vmem:[%s2379_s4 + $0xc8] sm:$0xff] }
 0x296   :  { %v741_v37 = vmul.f32 %v716_v46, %v2087_v5  ;;  %1569 = vmatprep.subr.bf16.mxu0 %v765_v39  ;;  %v756_v33 = vmul.f32 %v740_v38, %v2089_v7  ;;  %v1821_v42 = vpack.c.bf16 %v1341_v41, %v1340_v40  ;;  %v1343_v38 = vld [vmem:[%s2379_s4 + $0xd8] sm:$0xff]  ;;  %v1345_v46 = vld [vmem:[%s2379_s4 + $0xe8] sm:$0xff] }
 0x297   :  { %v759_v49 = vmul.f32 %v743_v45, %v2095_v51  ;;  %v1824_v34 = vpack.c.bf16 %v1343_v38, %v1342_v43  ;;  %v1344_v45 = vld [vmem:[%s2379_s4 + $0xe0] sm:$0xff] }
 0x298   :  { %v757_v50 = vmul.f32 %v741_v37, %v2087_v5  ;;  %v1827_v37 = vpack.c.bf16 %v1345_v46, %v1344_v45 }
 0x299   :  { %1570 = vmatpush3.bf16.msra.mxu0 %v765_v39  ;;  %v767_v53 = vpack.c.bf16 %v759_v49, %v758_v48  ;;  %v1818_v39 = vpack.c.bf16 %v1339_v17, %v1338_v30  ;;  %v1346_v48 = vld [vmem:[%s2379_s4 + $0xf0] sm:$0xff]  ;;  %v1347_v49 = vld [vmem:[%s2379_s4 + $0xf8] sm:$0xff] }
 0x29a   :  { %v766_v54 = vpack.c.bf16 %v757_v50, %v756_v33  ;;  %v1830_v33 = vpack.c.bf16 %v1347_v49, %v1346_v48  ;;  %v932_v50 = vlaneseq }
 0x29c   :  { %1571 = vmatprep.subr.bf16.mxu0 %v766_v54 }
 0x29d   :  { %1572 = vmatpush3.bf16.msra.mxu0 %v766_v54 }
 0x29e   :  { %1573 = vmatprep.subr.bf16.mxu0 %v767_v53 }
 0x2a1   :  { %1574 = vmatpush3.bf16.msra.mxu0 %v767_v53  ;;  %v2274_v53 = vshrl.u32 %v932_v50, 7  ;;  %v1348_v50 = vld [vmem:[%s2379_s4 + $0x100] sm:$0xff] }
 0x2a3   :  { %v934_v54 = vsub.s32 0, %v2274_v53 }
 0x2a4   :  { %1576 = vmatmul.mubr.bf16.vlgmr.msra.gmra.mrb[16].mxu0 %v2015_v10  ;;  %v896_v10 = vld [vmem:[%s2379_s4 + $0x78] sm:$0xff] }
 0x2a5   :  { %1579 = vmatprep.mubr.bf16.mxu0 %v2020_v11  ;;  %v1780_v57 = vpack.c.bf16 %v896_v10, %v895_v55  ;;  %v2280_v55 = vld [vmem:[%s2380_s5] sm:$0x7] }
 0x2a6   :  { %v2283_v10 = vrot.slane %v2280_v55, %v934_v54  ;;  %v1349_v54 = vld [vmem:[%s2379_s4 + $0x108] sm:$0xff] }
 0x2a7   :  { %1781 = vmatprep.subr.bf16.mxu1 %v1780_v57 }
 0x2a8   :  { %1783 = vmatpush3.bf16.msra.mxu1 %v1780_v57 }
 0x2ac   :  { %1580 = vmatmul.mubr.bf16.gmra.mrb[20].mxu0 %v2027_v12 }
 0x2ad   :  { %1583 = vmatprep.mubr.bf16.mxu0 %v2032_v13 }
 0x2b4   :  { %1584 = vmatmul.mubr.bf16.gmra.mrb[24].mxu0 %v2039_v14 }
 0x2b5   :  { %1587 = vmatprep.mubr.bf16.mxu0 %v2044_v15 }
 0x2bc   :  { %1588 = vmatmul.mubr.bf16.gmra.mrb[28].mxu0 %v2051_v16 }
 0x377   :  { %v1577_v11 = vpop.f32.mrb[16].mxu0 }
 0x378   :  { %v802_v12 = vpop.f32.mrb[17].mxu0  ;;  %v867_v16 = vmul.f32 %v1577_v11, %v2061_v25 }
 0x379   :  { %v865_v13 = vmul.f32 %v802_v12, %v2057_v21  ;;  %v1578_v14 = vpop.f32.mrb[18].mxu0 }
 0x37a   :  { %v805_v58 = vpop.f32.mrb[19].mxu0  ;;  %v868_v59 = vmul.f32 %v1578_v14, %v2059_v24 }
 0x37b   :  { %v866_v15 = vmul.f32 %v805_v58, %v2055_v20  ;;  %1623 = vmatprep.mubr.f32.mxu1 %v865_v13 }
 0x37d   :  { %1624 = vmatmul.mubr.f32.vlgmr.msra.gmra.mrb[16].mxu1 %v866_v15 }
 0x37e   :  { %1626 = vmatprep.mubr.f32.mxu1 %v867_v16 }
 0x37f   :  { %v1581_v60 = vpop.f32.mrb[20].mxu0 }
 0x380   :  { %v818_v56 = vpop.f32.mrb[21].mxu0  ;;  %v871_v0 = vmul.f32 %v1581_v60, %v2069_v32 }
 0x381   :  { %v869_v61 = vmul.f32 %v818_v56, %v2065_v29  ;;  %v1582_v62 = vpop.f32.mrb[22].mxu0  ;;  %1627 = vmatmul.mubr.f32.gmra.mrb[18].mxu1 %v868_v59 }
 0x382   :  { %v821_v63 = vpop.f32.mrb[23].mxu0  ;;  %v872_v20 = vmul.f32 %v1582_v62, %v2067_v31 }
 0x383   :  { %v870_v21 = vmul.f32 %v821_v63, %v2063_v28  ;;  %1629 = vmatprep.mubr.f32.mxu1 %v869_v61 }
 0x385   :  { %1630 = vmatmul.mubr.f32.gmra.mrb[20].mxu1 %v870_v21 }
 0x386   :  { %1632 = vmatprep.mubr.f32.mxu1 %v871_v0 }
 0x387   :  { %v1585_v25 = vpop.f32.mrb[24].mxu0 }
 0x388   :  { %v834_v1 = vpop.f32.mrb[25].mxu0  ;;  %v875_v4 = vmul.f32 %v1585_v25, %v2077_v47  ;;  %v1871_v47 = vmov 0.0|0.0  }
 0x389   :  { %v873_v24 = vmul.f32 %v834_v1, %v2073_v36  ;;  %v1586_v2 = vpop.f32.mrb[26].mxu0  ;;  %1633 = vmatmul.mubr.f32.gmra.mrb[22].mxu1 %v872_v20  ;;  %1784 = vmatprep.subr.bf16.mxu0 %v1871_v47 }
 0x38a   :  { %v837_v3 = vpop.f32.mrb[27].mxu0  ;;  %v876_v28 = vmul.f32 %v1586_v2, %v2075_v44  ;;  %1808 = vmatprep.subr.bf16.mxu1 %v1871_v47  ;;  %v1873_v44 = vmov 0.0  }
 0x38b   :  { %v874_v29 = vmul.f32 %v837_v3, %v2071_v35  ;;  %1635 = vmatprep.mubr.f32.mxu1 %v873_v24  ;;  %1679 = vmatprep.mubr.msk.f32.mxu0 %vm1872_vm0, %v1873_v44 }
 0x38d   :  { %1636 = vmatmul.mubr.f32.gmra.mrb[24].mxu1 %v874_v29 }
 0x38e   :  { %1638 = vmatprep.mubr.f32.mxu1 %v875_v4 }
 0x38f   :  { %v1589_v32 = vpop.f32.mrb[28].mxu0 }
 0x390   :  { %v850_v6 = vpop.f32.mrb[29].mxu0  ;;  %v879_v18 = vmul.f32 %v1589_v32, %v2097_v52 }
 0x391   :  { %v877_v31 = vmul.f32 %v850_v6, %v2089_v7  ;;  %v1590_v8 = vpop.f32.mrb[30].mxu0  ;;  %1639 = vmatmul.mubr.f32.gmra.mrb[26].mxu1 %v876_v28  ;;  %v1333_v7 = vld [vmem:[%s2379_s4 + $0x88] sm:$0xff] }
 0x392   :  { %v853_v9 = vpop.f32.mrb[31].mxu0  ;;  %v880_v35 = vmul.f32 %v1590_v8, %v2095_v51  ;;  %v1334_v51 = vld [vmem:[%s2379_s4 + $0x90] sm:$0xff] }
 0x393   :  { %v878_v36 = vmul.f32 %v853_v9, %v2087_v5  ;;  %1641 = vmatprep.mubr.f32.mxu1 %v877_v31  ;;  %v1332_v5 = vld [vmem:[%s2379_s4 + $0x80] sm:$0xff]  ;;  %v1812_v22 = vpack.c.bf16 %v1335_v19, %v1334_v51 }
 0x394   :  { %v1809_v52 = vpack.c.bf16 %v1333_v7, %v1332_v5 }
 0x395   :  { %1642 = vmatmul.mubr.f32.gmra.mrb[28].mxu1 %v878_v36 }
 0x396   :  { %1644 = vmatprep.mubr.f32.mxu1 %v879_v18  ;;  %1810 = vmatpush3.bf16.msra.mxu1 %v1809_v52 }
 0x397   :  { %1811 = vmatprep.subr.bf16.mxu1 %v1871_v47 }
 0x399   :  { %1645 = vmatmul.mubr.f32.gmra.mrb[30].mxu1 %v880_v35 }
 0x39a   :  { %1714 = vmatprep.mubr.msk.f32.mxu1 %vm1872_vm0, %v1873_v44  ;;  %1813 = vmatpush3.bf16.msra.mxu1 %v1812_v22 }
 0x39b   :  { %1814 = vmatprep.subr.bf16.mxu1 %v1871_v47 }
 0x39e   :  { %1816 = vmatpush3.bf16.msra.mxu1 %v1815_v27 }
 0x39f   :  { %1817 = vmatprep.subr.bf16.mxu1 %v1871_v47 }
 0x3a2   :  { %1819 = vmatpush3.bf16.msra.mxu1 %v1818_v39 }
 0x3a3   :  { %1820 = vmatprep.subr.bf16.mxu1 %v1871_v47 }
 0x3a6   :  { %1822 = vmatpush3.bf16.msra.mxu1 %v1821_v42 }
 0x3a7   :  { %1823 = vmatprep.subr.bf16.mxu1 %v1871_v47 }
 0x3aa   :  { %1825 = vmatpush3.bf16.msra.mxu1 %v1824_v34 }
 0x3ab   :  { %1826 = vmatprep.subr.bf16.mxu1 %v1871_v47 }
 0x3ae   :  { %1828 = vmatpush3.bf16.msra.mxu1 %v1827_v37 }
 0x3af   :  { %1829 = vmatprep.subr.bf16.mxu1 %v1871_v47 }
 0x3b2   :  { %1831 = vmatpush3.bf16.msra.mxu1 %v1830_v33  ;;  %v1097_v33 = vld [vmem:[%s2381_s3] sm:$0xff] }
 0x450   :  { %v1625_v57 = vpop.f32.mrb[16].mxu1 }
 0x451   :  { %v1008_v11 = vadd.f32 %v1625_v57, %v2283_v10  ;;  %v1002_v12 = vpop.f32.mrb[17].mxu1  ;;  %v1833_v57 = vpack.c.bf16 %v1349_v54, %v1348_v50 }
 0x452   :  { %v1003_v13 = vadd.f32 %v1002_v12, %v2283_v10 }
 0x453   :  { %v1082_v14 = vmax.f32 %v1008_v11, 0.0  ;;  %v1351_v11 = vld [vmem:[%s2379_s4 + $0x118] sm:$0xff] }
 0x454   :  { %v1081_v58 = vmax.f32 %v1003_v13, 0.0  ;;  %v1628_v15 = vpop.f32.mrb[18].mxu1  ;;  %v1353_v13 = vld [vmem:[%s2379_s4 + $0x128] sm:$0xff] }
 0x455   :  { %v1018_v16 = vadd.f32 %v1628_v15, %v2283_v10  ;;  %v1012_v59 = vpop.f32.mrb[19].mxu1  ;;  %v1355_v15 = vld [vmem:[%s2379_s4 + $0x138] sm:$0xff] }
 0x456   :  { %v1785_v60 = vpack.c.bf16 %v1082_v14, %v1081_v58  ;;  %v1013_v56 = vadd.f32 %v1012_v59, %v2283_v10  ;;  %v1354_v58 = vld [vmem:[%s2379_s4 + $0x130] sm:$0xff]  ;;  %v1356_v59 = vld [vmem:[%s2379_s4 + $0x140] sm:$0xff] }
 0x457   :  { %v1084_v61 = vmax.f32 %v1018_v16, 0.0  ;;  %v1842_v16 = vpack.c.bf16 %v1355_v15, %v1354_v58 }
 0x458   :  { %v1083_v62 = vmax.f32 %v1013_v56, 0.0  ;;  %v1631_v63 = vpop.f32.mrb[20].mxu1  ;;  %1786 = vmatpush3.bf16.msra.mxu0 %v1785_v60  ;;  %v1357_v60 = vld [vmem:[%s2379_s4 + $0x148] sm:$0xff] }
 0x459   :  { %v1028_v21 = vadd.f32 %v1631_v63, %v2283_v10  ;;  %v1022_v0 = vpop.f32.mrb[21].mxu1  ;;  %1787 = vmatprep.subr.bf16.mxu0 %v1871_v47  ;;  %v1845_v56 = vpack.c.bf16 %v1357_v60, %v1356_v59 }
 0x45a   :  { %v1788_v20 = vpack.c.bf16 %v1084_v61, %v1083_v62  ;;  %v1023_v25 = vadd.f32 %v1022_v0, %v2283_v10  ;;  %v1358_v61 = vld [vmem:[%s2379_s4 + $0x150] sm:$0xff]  ;;  %v1359_v62 = vld [vmem:[%s2379_s4 + $0x158] sm:$0xff]  ;;  %v1361_v0 = vld [vmem:[%s2379_s4 + $0x168] sm:$0xff] }
 0x45b   :  { %v1086_v1 = vmax.f32 %v1028_v21, 0.0  ;;  %v1848_v63 = vpack.c.bf16 %v1359_v62, %v1358_v61  ;;  %v1360_v21 = vld [vmem:[%s2379_s4 + $0x160] sm:$0xff] }
 0x45c   :  { %v1085_v24 = vmax.f32 %v1023_v25, 0.0  ;;  %v1634_v2 = vpop.f32.mrb[22].mxu1  ;;  %1789 = vmatpush3.bf16.msra.mxu0 %v1788_v20  ;;  %v1851_v20 = vpack.c.bf16 %v1361_v0, %v1360_v21 }
 0x45d   :  { %v1038_v3 = vadd.f32 %v1634_v2, %v2283_v10  ;;  %v1032_v29 = vpop.f32.mrb[23].mxu1  ;;  %1790 = vmatprep.subr.bf16.mxu0 %v1871_v47  ;;  %v1363_v2 = vld [vmem:[%s2379_s4 + $0x178] sm:$0xff] }
 0x45e   :  { %v1791_v4 = vpack.c.bf16 %v1086_v1, %v1085_v24  ;;  %v1033_v28 = vadd.f32 %v1032_v29, %v2283_v10  ;;  %v1362_v24 = vld [vmem:[%s2379_s4 + $0x170] sm:$0xff]  ;;  %v1170_v29 = vsub.s32 1, %v2274_v53 }
 0x45f   :  { %v1088_v32 = vmax.f32 %v1038_v3, 0.0  ;;  %v1854_v3 = vpack.c.bf16 %v1363_v2, %v1362_v24 }
 0x460   :  { %v1087_v6 = vmax.f32 %v1033_v28, 0.0  ;;  %v1637_v31 = vpop.f32.mrb[24].mxu1  ;;  %1792 = vmatpush3.bf16.msra.mxu0 %v1791_v4  ;;  %v1171_v4 = vrot.slane %v2280_v55, %v1170_v29 }
 0x461   :  { %v1048_v8 = vadd.f32 %v1637_v31, %v2283_v10  ;;  %v1042_v9 = vpop.f32.mrb[25].mxu1  ;;  %1793 = vmatprep.subr.bf16.mxu0 %v1871_v47  ;;  %v1245_v31 = vsub.s32 2, %v2274_v53 }
 0x462   :  { %v1794_v36 = vpack.c.bf16 %v1088_v32, %v1087_v6  ;;  %v1043_v18 = vadd.f32 %v1042_v9, %v2283_v10 }
 0x463   :  { %v1090_v35 = vmax.f32 %v1048_v8, 0.0  ;;  %v1246_v8 = vrot.slane %v2280_v55, %v1245_v31 }
 0x464   :  { %v1089_v5 = vmax.f32 %v1043_v18, 0.0  ;;  %v1640_v7 = vpop.f32.mrb[26].mxu1  ;;  %1795 = vmatpush3.bf16.msra.mxu0 %v1794_v36 }
 0x465   :  { %v1058_v51 = vadd.f32 %v1640_v7, %v2283_v10  ;;  %v1052_v52 = vpop.f32.mrb[27].mxu1  ;;  %1796 = vmatprep.subr.bf16.mxu0 %v1871_v47 }
 0x466   :  { %v1797_v19 = vpack.c.bf16 %v1090_v35, %v1089_v5  ;;  %v1053_v22 = vadd.f32 %v1052_v52, %v2283_v10 }
 0x467   :  { %v1092_v23 = vmax.f32 %v1058_v51, 0.0 }
 0x468   :  { %v1091_v26 = vmax.f32 %v1053_v22, 0.0  ;;  %v1643_v27 = vpop.f32.mrb[28].mxu1  ;;  %1798 = vmatpush3.bf16.msra.mxu0 %v1797_v19 }
 0x469   :  { %v1068_v30 = vadd.f32 %v1643_v27, %v2283_v10  ;;  %v1062_v17 = vpop.f32.mrb[29].mxu1  ;;  %1799 = vmatprep.subr.bf16.mxu0 %v1871_v47 }
 0x46a   :  { %v1800_v39 = vpack.c.bf16 %v1092_v23, %v1091_v26  ;;  %v1063_v40 = vadd.f32 %v1062_v17, %v2283_v10 }
 0x46b   :  { %v1094_v41 = vmax.f32 %v1068_v30, 0.0 }
 0x46c   :  { %v1093_v42 = vmax.f32 %v1063_v40, 0.0  ;;  %v1646_v43 = vpop.f32.mrb[30].mxu1  ;;  %1801 = vmatpush3.bf16.msra.mxu0 %v1800_v39 }
 0x46d   :  { %v1078_v38 = vadd.f32 %v1646_v43, %v2283_v10  ;;  %v1072_v34 = vpop.f32.mrb[31].mxu1  ;;  %1802 = vmatprep.subr.bf16.mxu0 %v1871_v47 }
 0x46e   :  { %v1803_v45 = vpack.c.bf16 %v1094_v41, %v1093_v42  ;;  %v1073_v46 = vadd.f32 %v1072_v34, %v2283_v10  ;;  %v1350_v10 = vld [vmem:[%s2379_s4 + $0x110] sm:$0xff] }
 0x46f   :  { %v1096_v37 = vmax.f32 %v1078_v38, 0.0  ;;  %v1836_v12 = vpack.c.bf16 %v1351_v11, %v1350_v10 }
 0x470   :  { %v1095_v48 = vmax.f32 %v1073_v46, 0.0  ;;  %1804 = vmatpush3.bf16.msra.mxu0 %v1803_v45 }
 0x471   :  { %1805 = vmatprep.subr.bf16.mxu0 %v1871_v47 }
 0x472   :  { %v1806_v49 = vpack.c.bf16 %v1096_v37, %v1095_v48 }
 0x474   :  { %1807 = vmatpush3.bf16.msra.mxu0 %v1806_v49 }
 0x475   :  { %1832 = vmatprep.subr.bf16.mxu0 %v1871_v47 }
 0x477   :  { %1680 = vmatmul.mubr.f32.vlgmr.msra.gmra.mrb[32].mxu0 %v1097_v33 }
 0x478   :  { %1749 = vmatprep.mubr.msk.f32.mxu0 %vm1872_vm0, %v1873_v44  ;;  %1834 = vmatpush3.bf16.msra.mxu0 %v1833_v57  ;;  %v1352_v44 = vld [vmem:[%s2379_s4 + $0x120] sm:$0xff] }
 0x479   :  { %1835 = vmatprep.subr.bf16.mxu0 %v1871_v47  ;;  %v1839_v14 = vpack.c.bf16 %v1353_v13, %v1352_v44 }
 0x47c   :  { %1837 = vmatpush3.bf16.msra.mxu0 %v1836_v12 }
 0x47d   :  { %1838 = vmatprep.subr.bf16.mxu0 %v1871_v47 }
 0x480   :  { %1840 = vmatpush3.bf16.msra.mxu0 %v1839_v14 }
 0x481   :  { %1841 = vmatprep.subr.bf16.mxu0 %v1871_v47 }
 0x484   :  { %1843 = vmatpush3.bf16.msra.mxu0 %v1842_v16 }
 0x485   :  { %1844 = vmatprep.subr.bf16.mxu0 %v1871_v47 }
 0x488   :  { %1846 = vmatpush3.bf16.msra.mxu0 %v1845_v56 }
 0x489   :  { %1847 = vmatprep.subr.bf16.mxu0 %v1871_v47 }
 0x48c   :  { %1849 = vmatpush3.bf16.msra.mxu0 %v1848_v63 }
 0x48d   :  { %1850 = vmatprep.subr.bf16.mxu0 %v1871_v47 }
 0x490   :  { %1852 = vmatpush3.bf16.msra.mxu0 %v1851_v20 }
 0x491   :  { %1853 = vmatprep.subr.bf16.mxu0 %v1871_v47 }
 0x494   :  { %1855 = vmatpush3.bf16.msra.mxu0 %v1854_v3 }
 0x54a   :  { %v1164_v25 = vpop.f32.mrb[32].mxu0 }
 0x54b   :  { %v1681_v1 = vpop.f32.mrb[33].mxu0  ;;  %1715 = vmatmul.mubr.f32.vlgmr.msra.gmra.mrb[32].mxu1 %v1164_v25 }
 0x61e   :  { %v1238_v28 = vpop.f32.mrb[32].mxu1 }
 0x61f   :  { %v1239_v32 = vadd.f32 %v1238_v28, %v1171_v4  ;;  %v1716_v47 = vpop.f32.mrb[33].mxu1 }
 0x621   :  { %v1242_v6 = vmax.f32 %v1239_v32, 0.0 }
 0x623   :  { %1750 = vmatmul.mubr.f32.vlgmr.msra.gmra.mrb[34].mxu0 %v1242_v6 }
 0x6f6   :  { %v1313_v9 = vpop.f32.mrb[34].mxu0 }
 0x6f7   :  { %v1314_v36 = vadd.f32 %v1313_v9, %v1246_v8  ;;  %v1751_v18 = vpop.f32.mrb[35].mxu0 }
 0x6f9   :  { %1317 = vst [vmem:[%s2382_s6] sm:$0xff] %v1314_v36 }

</bundles_post_ra>
